<compile_context>
chip_gen: v7x
topology: tpu7x:2x2x1
jax: 0.10.0
libtpu: 0.0.40
codegen_flags: <defaults>
</compile_context>

<pallas_src>
import jax
import jax.numpy as jnp
from jax.experimental import pallas as pl
from jax.experimental.pallas import tpu as pltpu


def nbeats_block_kernel(
    x_ref,
    w1_ref, b1_ref,
    w2_ref, b2_ref,
    w3_ref, b3_ref,
    w4_ref, b4_ref,
    wh_ref, bh_ref,          # fused heads: (hidden, 2*theta), (1, 2*theta)
    theta_ref,               # fused output: (tile_m, 2*theta)
):
    x = x_ref[...]

    # fc1 .. fc4 with ReLU (MXU matmuls, f32 accumulation; bias+relu on VPU).
    h = jnp.dot(x, w1_ref[...], preferred_element_type=jnp.float32) + b1_ref[...]
    h = jnp.maximum(h, 0.0)
    h = jnp.dot(h, w2_ref[...], preferred_element_type=jnp.float32) + b2_ref[...]
    h = jnp.maximum(h, 0.0)
    h = jnp.dot(h, w3_ref[...], preferred_element_type=jnp.float32) + b3_ref[...]
    h = jnp.maximum(h, 0.0)
    h = jnp.dot(h, w4_ref[...], preferred_element_type=jnp.float32) + b4_ref[...]
    h = jnp.maximum(h, 0.0)

    # Fused theta heads (no activation): single matmul, single store.
    theta = jnp.dot(h, wh_ref[...], preferred_element_type=jnp.float32) + bh_ref[...]
    theta_ref[...] = theta.astype(theta_ref.dtype)


def _round_up(n, m):
    return ((n + m - 1) // m) * m


def _choose_tiling(batch):
    """Return (padded_batch, tile_m)."""
    # Prefer an exactly-dividing, sublane-aligned large tile (no padding).
    for t in (1024, 512, 256, 128):
        if batch % t == 0:
            return batch, t
    # Modest batches: one full-array block (block == full dims is always legal).
    if batch <= 2048:
        return batch, batch
    # Large awkward batches: pad to a multiple of 512 (<= 511 wasted rows).
    padded = _round_up(batch, 512)
    return padded, 512


@jax.jit
def nbeats_block_forward(x, params):
    """x: (batch, input_size) f32.  params: (in,out) weights + (1,out) biases.

    Returns (backcast, forecast), each (batch, theta_size), matching
    NBEATSBlock.forward (identical for all stack_type values in the spec).
    """
    batch, input_size = x.shape
    hidden_size = params["w1"].shape[1]
    theta_size = params["wb"].shape[1]

    # Fuse the two heads along the output (lane) dimension.
    wh = jnp.concatenate([params["wb"], params["wf"]], axis=1)   # (H, 2*T)
    bh = jnp.concatenate([params["bb"], params["bf"]], axis=1)   # (1, 2*T)

    padded_batch, tile_m = _choose_tiling(batch)
    if padded_batch != batch:
        x_in = jnp.pad(x, ((0, padded_batch - batch), (0, 0)))
    else:
        x_in = x
    grid = (padded_batch // tile_m,)

    weight_args = (
        params["w1"], params["b1"],
        params["w2"], params["b2"],
        params["w3"], params["b3"],
        params["w4"], params["b4"],
        wh, bh,
    )

    # Weights/biases: full-array blocks with constant index_map -> VMEM-resident
    # across all batch tiles.
    def const_spec(a):
        return pl.BlockSpec(a.shape, lambda i: (0,) * a.ndim)

    in_specs = [pl.BlockSpec((tile_m, input_size), lambda i: (i, 0))]
    in_specs += [const_spec(a) for a in weight_args]

    out_shape = jax.ShapeDtypeStruct((padded_batch, 2 * theta_size), jnp.float32)
    out_specs = pl.BlockSpec((tile_m, 2 * theta_size), lambda i: (i, 0))

    # Advisory cost estimate for XLA scheduling.
    flops = 2 * padded_batch * (
        input_size * hidden_size
        + 3 * hidden_size * hidden_size
        + hidden_size * 2 * theta_size
    )
    bytes_accessed = 4 * (
        padded_batch * input_size
        + sum(int(a.size) for a in weight_args)
        + padded_batch * 2 * theta_size
    )

    theta = pl.pallas_call(
        nbeats_block_kernel,
        out_shape=out_shape,
        grid=grid,
        in_specs=in_specs,
        out_specs=out_specs,
        compiler_params=pltpu.CompilerParams(
            dimension_semantics=("parallel",),   # batch tiles are independent
            vmem_limit_bytes=32 * 1024 * 1024,   # safe headroom on v7x's 64 MiB
        ),
        cost_estimate=pl.CostEstimate(
            flops=flops, transcendentals=0, bytes_accessed=bytes_accessed
        ),
    )(x_in, *weight_args)

    backcast = theta[:batch, :theta_size]
    forecast = theta[:batch, theta_size:]
    return backcast, forecast


def init_params(key, input_size, theta_size, hidden_size):
    """Deterministic init mimicking nn.Linear default U(-1/sqrt(fan_in), +).
    Weights stored transposed: (in, out).  Biases shaped (1, out)."""
    def linear(k, fan_in, fan_out):
        kw, kb = jax.random.split(k)
        bound = 1.0 / jnp.sqrt(jnp.float32(fan_in))
        w = jax.random.uniform(kw, (fan_in, fan_out), jnp.float32, -bound, bound)
        b = jax.random.uniform(kb, (1, fan_out), jnp.float32, -bound, bound)
        return w, b

    keys = jax.random.split(key, 6)
    p = {}
    p["w1"], p["b1"] = linear(keys[0], input_size, hidden_size)
    p["w2"], p["b2"] = linear(keys[1], hidden_size, hidden_size)
    p["w3"], p["b3"] = linear(keys[2], hidden_size, hidden_size)
    p["w4"], p["b4"] = linear(keys[3], hidden_size, hidden_size)
    p["wb"], p["bb"] = linear(keys[4], hidden_size, theta_size)
    p["wf"], p["bf"] = linear(keys[5], hidden_size, theta_size)
    return p


def nbeats_reference(x, p):
    """Pure-JAX reference of the same forward pass."""
    h = jax.nn.relu(x @ p["w1"] + p["b1"])
    h = jax.nn.relu(h @ p["w2"] + p["b2"])
    h = jax.nn.relu(h @ p["w3"] + p["b3"])
    h = jax.nn.relu(h @ p["w4"] + p["b4"])
    return h @ p["wb"] + p["bb"], h @ p["wf"] + p["bf"]


# TODO(synk): trend/seasonality basis expansion and multi-block residual
# stacking are outside this single-block module spec; the generic basis
# (backcast=theta_b, forecast=theta_f) matches the reference forward exactly.

if __name__ == "__main__":
    input_size = 16   # length of input window
    theta_size = 8    # prediction length / theta dimension
    hidden_size = 32

    key = jax.random.PRNGKey(0)
    k_params, k_x = jax.random.split(key)
    params = init_params(k_params, input_size, theta_size, hidden_size)

    def check(batch, seed):
        x = jax.random.normal(jax.random.PRNGKey(seed), (batch, input_size),
                              jnp.float32)
        b, f = nbeats_block_forward(x, params)
        jax.block_until_ready((b, f))
        rb, rf = nbeats_reference(x, params)
        assert b.shape == (batch, theta_size)
        assert f.shape == (batch, theta_size)
        assert jnp.allclose(b, rb, atol=1e-5, rtol=1e-5)
        assert jnp.allclose(f, rf, atol=1e-5, rtol=1e-5)

    check(4, 1)      # small batch: single full-array block
    check(256, 2)    # divisible: single 256-row tile
    check(384, 3)    # divisible by 128: 3-step grid, weights VMEM-resident
    check(2050, 4)   # awkward large batch: zero-pad to 512-row tiles + slice

    print("KERNEL_OK")
</pallas_src>

<mosaic_0001>
module attributes {stable_mosaic.version = 11 : i64} {
  func.func @nbeats_block_kernel(%arg0: i32, %arg1: memref<4x16xf32, #tpu.memory_space<vmem>>, %arg2: memref<16x32xf32, #tpu.memory_space<vmem>>, %arg3: memref<1x32xf32, #tpu.memory_space<vmem>>, %arg4: memref<32x32xf32, #tpu.memory_space<vmem>>, %arg5: memref<1x32xf32, #tpu.memory_space<vmem>>, %arg6: memref<32x32xf32, #tpu.memory_space<vmem>>, %arg7: memref<1x32xf32, #tpu.memory_space<vmem>>, %arg8: memref<32x32xf32, #tpu.memory_space<vmem>>, %arg9: memref<1x32xf32, #tpu.memory_space<vmem>>, %arg10: memref<32x16xf32, #tpu.memory_space<vmem>>, %arg11: memref<1x16xf32, #tpu.memory_space<vmem>>, %arg12: memref<4x16xf32, #tpu.memory_space<vmem>>) attributes {dimension_semantics = [#tpu.dimension_semantics<parallel>], iteration_bounds = array<i64: 1>, scalar_prefetch = 0 : i64, scratch_operands = 0 : i64, tpu.core_type = #tpu.core_type<tc>, window_params = [{transform_indices = @transform_0, window_bounds = array<i64: 4, 16>}, {pipeline_mode = #tpu.pipeline_mode<synchronous>, transform_indices = @transform_1, window_bounds = array<i64: 16, 32>}, {pipeline_mode = #tpu.pipeline_mode<synchronous>, transform_indices = @transform_2, window_bounds = array<i64: 1, 32>}, {pipeline_mode = #tpu.pipeline_mode<synchronous>, transform_indices = @transform_3, window_bounds = array<i64: 32, 32>}, {pipeline_mode = #tpu.pipeline_mode<synchronous>, transform_indices = @transform_4, window_bounds = array<i64: 1, 32>}, {pipeline_mode = #tpu.pipeline_mode<synchronous>, transform_indices = @transform_5, window_bounds = array<i64: 32, 32>}, {pipeline_mode = #tpu.pipeline_mode<synchronous>, transform_indices = @transform_6, window_bounds = array<i64: 1, 32>}, {pipeline_mode = #tpu.pipeline_mode<synchronous>, transform_indices = @transform_7, window_bounds = array<i64: 32, 32>}, {pipeline_mode = #tpu.pipeline_mode<synchronous>, transform_indices = @transform_8, window_bounds = array<i64: 1, 32>}, {pipeline_mode = #tpu.pipeline_mode<synchronous>, transform_indices = @transform_9, window_bounds = array<i64: 32, 16>}, {pipeline_mode = #tpu.pipeline_mode<synchronous>, transform_indices = @transform_10, window_bounds = array<i64: 1, 16>}, {transform_indices = @transform_11, window_bounds = array<i64: 4, 16>}]} {
    %c0 = arith.constant 0 : index
    %c0_0 = arith.constant 0 : index
    %0 = vector.load %arg1[%c0, %c0_0] : memref<4x16xf32, #tpu.memory_space<vmem>>, vector<4x16xf32>
    %c0_1 = arith.constant 0 : index
    %c0_2 = arith.constant 0 : index
    %1 = vector.load %arg2[%c0_1, %c0_2] : memref<16x32xf32, #tpu.memory_space<vmem>>, vector<16x32xf32>
    %cst = arith.constant dense<0.000000e+00> : vector<4x32xf32>
    %2 = tpu.matmul %0, %1, %cst {dimension_numbers = #tpu.dot_dimension_numbers<[1], [0], [0], [1], [0, 0, 1, 1], [], []>} : vector<4x16xf32>, vector<16x32xf32>, vector<4x32xf32> -> vector<4x32xf32>
    %c0_3 = arith.constant 0 : index
    %c0_4 = arith.constant 0 : index
    %3 = vector.load %arg3[%c0_3, %c0_4] : memref<1x32xf32, #tpu.memory_space<vmem>>, vector<1x32xf32>
    %4 = vector.broadcast %3 : vector<1x32xf32> to vector<4x32xf32>
    %5 = arith.addf %2, %4 : vector<4x32xf32>
    %cst_5 = arith.constant 0.000000e+00 : f32
    %6 = vector.broadcast %cst_5 : f32 to vector<4x32xf32>
    %7 = arith.maximumf %5, %6 : vector<4x32xf32>
    %c0_6 = arith.constant 0 : index
    %c0_7 = arith.constant 0 : index
    %8 = vector.load %arg4[%c0_6, %c0_7] : memref<32x32xf32, #tpu.memory_space<vmem>>, vector<32x32xf32>
    %cst_8 = arith.constant dense<0.000000e+00> : vector<4x32xf32>
    %9 = tpu.matmul %7, %8, %cst_8 {dimension_numbers = #tpu.dot_dimension_numbers<[1], [0], [0], [1], [0, 0, 1, 1], [], []>} : vector<4x32xf32>, vector<32x32xf32>, vector<4x32xf32> -> vector<4x32xf32>
    %c0_9 = arith.constant 0 : index
    %c0_10 = arith.constant 0 : index
    %10 = vector.load %arg5[%c0_9, %c0_10] : memref<1x32xf32, #tpu.memory_space<vmem>>, vector<1x32xf32>
    %11 = vector.broadcast %10 : vector<1x32xf32> to vector<4x32xf32>
    %12 = arith.addf %9, %11 : vector<4x32xf32>
    %cst_11 = arith.constant 0.000000e+00 : f32
    %13 = vector.broadcast %cst_11 : f32 to vector<4x32xf32>
    %14 = arith.maximumf %12, %13 : vector<4x32xf32>
    %c0_12 = arith.constant 0 : index
    %c0_13 = arith.constant 0 : index
    %15 = vector.load %arg6[%c0_12, %c0_13] : memref<32x32xf32, #tpu.memory_space<vmem>>, vector<32x32xf32>
    %cst_14 = arith.constant dense<0.000000e+00> : vector<4x32xf32>
    %16 = tpu.matmul %14, %15, %cst_14 {dimension_numbers = #tpu.dot_dimension_numbers<[1], [0], [0], [1], [0, 0, 1, 1], [], []>} : vector<4x32xf32>, vector<32x32xf32>, vector<4x32xf32> -> vector<4x32xf32>
    %c0_15 = arith.constant 0 : index
    %c0_16 = arith.constant 0 : index
    %17 = vector.load %arg7[%c0_15, %c0_16] : memref<1x32xf32, #tpu.memory_space<vmem>>, vector<1x32xf32>
    %18 = vector.broadcast %17 : vector<1x32xf32> to vector<4x32xf32>
    %19 = arith.addf %16, %18 : vector<4x32xf32>
    %cst_17 = arith.constant 0.000000e+00 : f32
    %20 = vector.broadcast %cst_17 : f32 to vector<4x32xf32>
    %21 = arith.maximumf %19, %20 : vector<4x32xf32>
    %c0_18 = arith.constant 0 : index
    %c0_19 = arith.constant 0 : index
    %22 = vector.load %arg8[%c0_18, %c0_19] : memref<32x32xf32, #tpu.memory_space<vmem>>, vector<32x32xf32>
    %cst_20 = arith.constant dense<0.000000e+00> : vector<4x32xf32>
    %23 = tpu.matmul %21, %22, %cst_20 {dimension_numbers = #tpu.dot_dimension_numbers<[1], [0], [0], [1], [0, 0, 1, 1], [], []>} : vector<4x32xf32>, vector<32x32xf32>, vector<4x32xf32> -> vector<4x32xf32>
    %c0_21 = arith.constant 0 : index
    %c0_22 = arith.constant 0 : index
    %24 = vector.load %arg9[%c0_21, %c0_22] : memref<1x32xf32, #tpu.memory_space<vmem>>, vector<1x32xf32>
    %25 = vector.broadcast %24 : vector<1x32xf32> to vector<4x32xf32>
    %26 = arith.addf %23, %25 : vector<4x32xf32>
    %cst_23 = arith.constant 0.000000e+00 : f32
    %27 = vector.broadcast %cst_23 : f32 to vector<4x32xf32>
    %28 = arith.maximumf %26, %27 : vector<4x32xf32>
    %c0_24 = arith.constant 0 : index
    %c0_25 = arith.constant 0 : index
    %29 = vector.load %arg10[%c0_24, %c0_25] : memref<32x16xf32, #tpu.memory_space<vmem>>, vector<32x16xf32>
    %cst_26 = arith.constant dense<0.000000e+00> : vector<4x16xf32>
    %30 = tpu.matmul %28, %29, %cst_26 {dimension_numbers = #tpu.dot_dimension_numbers<[1], [0], [0], [1], [0, 0, 1, 1], [], []>} : vector<4x32xf32>, vector<32x16xf32>, vector<4x16xf32> -> vector<4x16xf32>
    %c0_27 = arith.constant 0 : index
    %c0_28 = arith.constant 0 : index
    %31 = vector.load %arg11[%c0_27, %c0_28] : memref<1x16xf32, #tpu.memory_space<vmem>>, vector<1x16xf32>
    %32 = vector.broadcast %31 : vector<1x16xf32> to vector<4x16xf32>
    %33 = arith.addf %30, %32 : vector<4x16xf32>
    %c0_29 = arith.constant 0 : index
    %c0_30 = arith.constant 0 : index
    %34 = vector.load %arg12[%c0_29, %c0_30] : memref<4x16xf32, #tpu.memory_space<vmem>>, vector<4x16xf32>
    tpu.vector_store %arg12[%c0_29, %c0_30], %33 {strides = array<i32>} : memref<4x16xf32, #tpu.memory_space<vmem>>, vector<4x16xf32>,
    return
  }
  func.func @transform_0(%arg0: i32) -> (i32, i32) {
    %c0_i32 = arith.constant 0 : i32
    %c0_i32_0 = arith.constant 0 : i32
    return %arg0, %c0_i32 : i32, i32
  }
  func.func @transform_1(%arg0: i32) -> (i32, i32) {
    %c0_i32 = arith.constant 0 : i32
    %c0_i32_0 = arith.constant 0 : i32
    %c0_i32_1 = arith.constant 0 : i32
    return %c0_i32, %c0_i32_0 : i32, i32
  }
  func.func @transform_2(%arg0: i32) -> (i32, i32) {
    %c0_i32 = arith.constant 0 : i32
    %c0_i32_0 = arith.constant 0 : i32
    %c0_i32_1 = arith.constant 0 : i32
    return %c0_i32, %c0_i32_0 : i32, i32
  }
  func.func @transform_3(%arg0: i32) -> (i32, i32) {
    %c0_i32 = arith.constant 0 : i32
    %c0_i32_0 = arith.constant 0 : i32
    %c0_i32_1 = arith.constant 0 : i32
    return %c0_i32, %c0_i32_0 : i32, i32
  }
  func.func @transform_4(%arg0: i32) -> (i32, i32) {
    %c0_i32 = arith.constant 0 : i32
    %c0_i32_0 = arith.constant 0 : i32
    %c0_i32_1 = arith.constant 0 : i32
    return %c0_i32, %c0_i32_0 : i32, i32
  }
  func.func @transform_5(%arg0: i32) -> (i32, i32) {
    %c0_i32 = arith.constant 0 : i32
    %c0_i32_0 = arith.constant 0 : i32
    %c0_i32_1 = arith.constant 0 : i32
    return %c0_i32, %c0_i32_0 : i32, i32
  }
  func.func @transform_6(%arg0: i32) -> (i32, i32) {
    %c0_i32 = arith.constant 0 : i32
    %c0_i32_0 = arith.constant 0 : i32
    %c0_i32_1 = arith.constant 0 : i32
    return %c0_i32, %c0_i32_0 : i32, i32
  }
  func.func @transform_7(%arg0: i32) -> (i32, i32) {
    %c0_i32 = arith.constant 0 : i32
    %c0_i32_0 = arith.constant 0 : i32
    %c0_i32_1 = arith.constant 0 : i32
    return %c0_i32, %c0_i32_0 : i32, i32
  }
  func.func @transform_8(%arg0: i32) -> (i32, i32) {
    %c0_i32 = arith.constant 0 : i32
    %c0_i32_0 = arith.constant 0 : i32
    %c0_i32_1 = arith.constant 0 : i32
    return %c0_i32, %c0_i32_0 : i32, i32
  }
  func.func @transform_9(%arg0: i32) -> (i32, i32) {
    %c0_i32 = arith.constant 0 : i32
    %c0_i32_0 = arith.constant 0 : i32
    %c0_i32_1 = arith.constant 0 : i32
    return %c0_i32, %c0_i32_0 : i32, i32
  }
  func.func @transform_10(%arg0: i32) -> (i32, i32) {
    %c0_i32 = arith.constant 0 : i32
    %c0_i32_0 = arith.constant 0 : i32
    %c0_i32_1 = arith.constant 0 : i32
    return %c0_i32, %c0_i32_0 : i32, i32
  }
  func.func @transform_11(%arg0: i32) -> (i32, i32) {
    %c0_i32 = arith.constant 0 : i32
    %c0_i32_0 = arith.constant 0 : i32
    return %arg0, %c0_i32 : i32, i32
  }
}

</mosaic_0001>

<bundles_post_ra>
// kernel: nbeats_block_forward.1
= control target key start
LH: loop header
LB: loop body
LE: loop exit
PB: predicated region body
PF: predicated region fallthrough
CT: control target
= control target key end

     0   :  { %v583_v0 = vmov 0.0|0.0   ;;  %vm584_vm0 = vmmov 0   ;;  %v585_v3 = vmov 0.0   ;;  %vm48_vm1 = vcmask 130048   ;;  %s739_s1 = inlined_call_operand.vmem [shape: f32[16,32], index: 1, kind: input, shape index: {}]   ;;  %s740_s3 = inlined_call_operand.vmem [shape: f32[32,32], index: 3, kind: input, shape index: {}]   ;;  %s741_s0 = inlined_call_operand.vmem [shape: f32[4,16], index: 0, kind: input, shape index: {}]   ;;  %s742_s5 = inlined_call_operand.vmem [shape: f32[32,32], index: 5, kind: input, shape index: {}]   ;;  %s743_s2 = inlined_call_operand.vmem [shape: f32[1,32], index: 2, kind: input, shape index: {}]   ;;  %s744_s7 = inlined_call_operand.vmem [shape: f32[32,32], index: 7, kind: input, shape index: {}]   ;;  %s745_s4 = inlined_call_operand.vmem [shape: f32[1,32], index: 4, kind: input, shape index: {}]   ;;  %s746_s9 = inlined_call_operand.vmem [shape: f32[32,16], index: 9, kind: input, shape index: {}]   ;;  %s747_s6 = inlined_call_operand.vmem [shape: f32[1,32], index: 6, kind: input, shape index: {}]   ;;  %s748_s8 = inlined_call_operand.vmem [shape: f32[1,32], index: 8, kind: input, shape index: {}]   ;;  %s749_s10 = inlined_call_operand.vmem [shape: f32[1,16], index: 10, kind: input, shape index: {}]   ;;  %s750_s11 = inlined_call_operand.vmem [shape: f32[4,16], index: 11, kind: output, shape index: {}]  }
   0x1   :  { %553 = vmatprep.subr.bf16.mxu0 %v583_v0  ;;  %v39_v1 = vld [vmem:[%s739_s1] sm:$0xff]  ;;  %v40_v2 = vld [vmem:[%s739_s1 + $0x8] sm:$0xff]  ;;  %506 = vmatprep.mubr.msk.f32.mxu0 %vm584_vm0, %v585_v3  ;;  %v125_v9 = vld [vmem:[%s740_s3 + $0x10] sm:$0xff]  ;;  %vm134_vm2 = vcmask 261120   ;;  %vm463_vm3 = vcmask 125952  }
   0x2   :  { %v554_v4 = vpack.c.bf16 %v40_v2, %v39_v1  ;;  %556 = vmatprep.subr.bf16.mxu1 %v583_v0  ;;  %v123_v5 = vld [vmem:[%s740_s3] sm:$0xff]  ;;  %v124_v6 = vld [vmem:[%s740_s3 + $0x8] sm:$0xff]  ;;  %517 = vmatprep.mubr.msk.f32.mxu1 %vm584_vm0, %v585_v3  ;;  %v126_v10 = vld [vmem:[%s740_s3 + $0x18] sm:$0xff] }
   0x3   :  { %v557_v7 = vpack.c.bf16 %v124_v6, %v123_v5  ;;  %v38_v8 = vld [vmem:[%s741_s0] sm:$0xf]  ;;  %v560_v11 = vpack.c.bf16 %v126_v10, %v125_v9  ;;  %v210_v13 = vld [vmem:[%s742_s5 + $0x8] sm:$0xff]  ;;  %v211_v20 = vld [vmem:[%s742_s5 + $0x10] sm:$0xff] }
   0x4   :  { %555 = vmatpush3.bf16.msra.mxu0 %v554_v4  ;;  %v209_v12 = vld [vmem:[%s742_s5] sm:$0xff]  ;;  %v212_v21 = vld [vmem:[%s742_s5 + $0x18] sm:$0xff]  ;;  %v295_v24 = vld [vmem:[%s744_s7 + $0x8] sm:$0xff] }
   0x5   :  { %558 = vmatpush3.bf16.msra.mxu1 %v557_v7  ;;  %562 = vmatprep.subr.bf16.mxu0 %v583_v0  ;;  %v563_v14 = vpack.c.bf16 %v210_v13, %v209_v12  ;;  %v469_v15 = vld [vmem:[%s743_s2] ss:$0 sm:$0xff]  ;;  %v566_v22 = vpack.c.bf16 %v212_v21, %v211_v20  ;;  %v296_v31 = vld [vmem:[%s744_s7 + $0x10] sm:$0xff]  ;;  %v297_v32 = vld [vmem:[%s744_s7 + $0x18] sm:$0xff] }
   0x6   :  { %559 = vmatprep.subr.bf16.mxu1 %v583_v0  ;;  %v294_v23 = vld [vmem:[%s744_s7] sm:$0xff]  ;;  %v572_v33 = vpack.c.bf16 %v297_v32, %v296_v31  ;;  %v380_v35 = vld [vmem:[%s746_s9 + $0x8] sm:$0xff]  ;;  %v381_v42 = vld [vmem:[%s746_s9 + $0x10] sm:$0xff] }
   0x7   :  { %507 = vmatmul.mubr.msk.f32.vlgmr.msra.gmra.mrb[0].mxu0 %vm48_vm1, %v38_v8  ;;  %v569_v25 = vpack.c.bf16 %v295_v24, %v294_v23  ;;  %v471_v26 = vld [vmem:[%s745_s4] ss:$0 sm:$0xff]  ;;  %v382_v43 = vld [vmem:[%s746_s9 + $0x18] sm:$0xff] }
   0x8   :  { %528 = vmatprep.mubr.msk.f32.mxu0 %vm584_vm0, %v585_v3  ;;  %564 = vmatpush3.bf16.msra.mxu0 %v563_v14  ;;  %v379_v34 = vld [vmem:[%s746_s9] sm:$0xff]  ;;  %v578_v44 = vpack.c.bf16 %v382_v43, %v381_v42 }
   0x9   :  { %561 = vmatpush3.bf16.msra.mxu1 %v560_v11  ;;  %565 = vmatprep.subr.bf16.mxu0 %v583_v0  ;;  %v575_v36 = vpack.c.bf16 %v380_v35, %v379_v34  ;;  %v473_v37 = vld [vmem:[%s747_s6] ss:$0 sm:$0xff] }
   0xa   :  { %568 = vmatprep.subr.bf16.mxu1 %v583_v0  ;;  %v475_v45 = vld [vmem:[%s748_s8] ss:$0 sm:$0xff] }
   0xb   :  { %v477_v50 = vld [vmem:[%s749_s10] ss:$0 sm:$0xff] }
   0xc   :  { %567 = vmatpush3.bf16.msra.mxu0 %v566_v22 }
   0xd   :  { %574 = vmatprep.subr.bf16.mxu0 %v583_v0 }
  0xda   :  { %v118_v16 = vpop.f32.mrb[0].mxu0 }
  0xdb   :  { %v119_v17 = vadd.f32 %v469_v15, %v118_v16  ;;  %v508_v18 = vpop.f32.mrb[1].mxu0 }
  0xdd   :  { %v122_v19 = vmax.f32 %v119_v17, 0.0 }
  0xdf   :  { %518 = vmatmul.mubr.msk.f32.vlgmr.msra.gmra.mrb[0].mxu1 %vm134_vm2, %v122_v19 }
  0xe0   :  { %539 = vmatprep.mubr.msk.f32.mxu1 %vm584_vm0, %v585_v3  ;;  %570 = vmatpush3.bf16.msra.mxu1 %v569_v25 }
  0xe1   :  { %571 = vmatprep.subr.bf16.mxu1 %v583_v0 }
  0xe4   :  { %573 = vmatpush3.bf16.msra.mxu1 %v572_v33 }
 0x1b2   :  { %v204_v27 = vpop.f32.mrb[0].mxu1 }
 0x1b3   :  { %v205_v28 = vadd.f32 %v471_v26, %v204_v27  ;;  %v519_v29 = vpop.f32.mrb[1].mxu1 }
 0x1b5   :  { %v208_v30 = vmax.f32 %v205_v28, 0.0 }
 0x1b7   :  { %529 = vmatmul.mubr.msk.f32.vlgmr.msra.gmra.mrb[2].mxu0 %vm134_vm2, %v208_v30 }
 0x1b8   :  { %550 = vmatprep.mubr.msk.f32.mxu0 %vm584_vm0, %v585_v3  ;;  %576 = vmatpush3.bf16.msra.mxu0 %v575_v36 }
 0x1b9   :  { %577 = vmatprep.subr.bf16.mxu0 %v583_v0 }
 0x1bc   :  { %579 = vmatpush3.bf16.msra.mxu0 %v578_v44 }
 0x28a   :  { %v289_v38 = vpop.f32.mrb[2].mxu0 }
 0x28b   :  { %v290_v39 = vadd.f32 %v473_v37, %v289_v38  ;;  %v530_v40 = vpop.f32.mrb[3].mxu0 }
 0x28d   :  { %v293_v41 = vmax.f32 %v290_v39, 0.0 }
 0x28f   :  { %540 = vmatmul.mubr.msk.f32.vlgmr.msra.gmra.mrb[2].mxu1 %vm134_vm2, %v293_v41 }
 0x362   :  { %v374_v46 = vpop.f32.mrb[2].mxu1 }
 0x363   :  { %v375_v47 = vadd.f32 %v475_v45, %v374_v46  ;;  %v541_v48 = vpop.f32.mrb[3].mxu1 }
 0x365   :  { %v378_v49 = vmax.f32 %v375_v47, 0.0 }
 0x367   :  { %551 = vmatmul.mubr.msk.f32.vlgmr.msra.gmra.mrb[4].mxu0 %vm134_vm2, %v378_v49 }
 0x43a   :  { %v459_v51 = vpop.f32.mrb[4].mxu0 }
 0x43b   :  { %v460_v52 = vadd.f32 %v477_v50, %v459_v51  ;;  %v552_v53 = vpop.f32.mrb[5].mxu0 }
 0x43d   :  { %464 = vst.msk [vmem:[%s750_s11] sm:$0xf] %vm463_vm3, %v460_v52 }

</bundles_post_ra>
